<compile_context>
chip_gen: v5e
topology: v5e:2x2
jax: 0.10.0
libtpu: 0.0.40
codegen_flags: <defaults>
</compile_context>

<pallas_src>
import math

import jax
import jax.numpy as jnp
from jax.experimental import pallas as pl
from jax.experimental.pallas import tpu as pltpu

# Batch tile (lane dimension): multiple of 128.  4096 rows amortize the
# ~0.35 us per-grid-step overhead to <5% while keeping the double-buffered
# x^T tile (2 x 16 x 4096 x 4 B = 512 KiB) and (hidden, TILE_B) intermediates
# well inside VMEM on v5e/v6e/v7x.
_TILE_B = 4096


def _value_mlp_kernel(x_ref, w1_ref, b1_ref, w2_ref, b2_ref, w3_ref, b3_ref,
                      o_ref):
    # x_ref: (state_dim, TB) f32, batch on the lane dim.  Cast to bf16 on the
    # VPU so both matmuls are single-pass bf16 MXU with f32 accumulation.
    x = x_ref[...].astype(jnp.bfloat16)

    # Layer 1: (H, S) @ (S, TB) -> (H, TB), f32 accumulate; bias/ReLU in f32.
    h1 = jnp.dot(w1_ref[...], x, preferred_element_type=jnp.float32)
    h1 = jnp.maximum(h1 + b1_ref[...], 0.0)

    # Layer 2: (H, H) @ (H, TB) -> (H, TB).
    h2 = jnp.dot(w2_ref[...], h1.astype(jnp.bfloat16),
                 preferred_element_type=jnp.float32)
    h2 = jnp.maximum(h2 + b2_ref[...], 0.0)

    # Output head (out_features == 1): VPU multiply against the (H, 1) weight
    # column + cross-sublane reduce -> lane-dense (1, TB) row (no 1-column
    # MXU matmul, no masked width-1 stores).
    out = jnp.sum(h2 * w3_ref[...], axis=0, keepdims=True)
    o_ref[...] = out + b3_ref[...]


def value_function_forward(state, params, *, tile_b=_TILE_B):
    """state: (B, state_dim) f32.  Returns (B,) f32, matching Squeeze(-1)."""
    w1, b1, w2, b2, w3, b3 = params
    B, state_dim = state.shape
    hidden = w1.shape[0]

    # One-time layout plumbing (cheap: the kernel is MXU-push bound, ~40x over
    # the HBM stream, so one extra pass over the small input is in the noise):
    #   * batch onto the lane dimension,
    #   * matmul weights to bf16 (single-pass MXU),
    #   * head weight as a (H, 1) column for the VPU/XLU reduce.
    x_t = state.T                                   # (state_dim, B)
    w1_bf = w1.astype(jnp.bfloat16)
    w2_bf = w2.astype(jnp.bfloat16)
    w3_col = w3.reshape(hidden, 1)

    if B <= tile_b:
        # Single block covering the full arrays (any B allowed when the block
        # equals the array extent); launch-latency dominated anyway.
        blk_b, n_tiles = B, 1
    else:
        # tile_b is a multiple of 128 -> satisfies the (8,128) lane constraint;
        # Pallas masks the ragged final block, no wrapper-side padding needed.
        # On v7x keep >= 2 tiles so the "parallel" axis feeds both TensorCores.
        blk_b, n_tiles = tile_b, pl.cdiv(B, tile_b)

    # Grid-invariant blocks: weights/biases DMA'd once, VMEM-resident after.
    const = lambda a: pl.BlockSpec(a.shape, lambda i: (0, 0))

    out = pl.pallas_call(
        _value_mlp_kernel,
        out_shape=jax.ShapeDtypeStruct((1, B), jnp.float32),
        grid=(n_tiles,),
        in_specs=[pl.BlockSpec((state_dim, blk_b), lambda i: (0, i)),
                  const(w1_bf), const(b1), const(w2_bf), const(b2),
                  const(w3_col), const(b3)],
        out_specs=pl.BlockSpec((1, blk_b), lambda i: (0, i)),
        compiler_params=pltpu.CompilerParams(
            dimension_semantics=("parallel",)),
    )(x_t, w1_bf, b1, w2_bf, b2, w3_col, b3)
    return out[0]  # squeeze(-1) equivalent


def init_value_function_params(key, state_dim, hidden_dim=32, n_hidden=2):
    """torch.nn.Linear-style init.

    Weights stored in torch layout (out_features, in_features) so the
    lane-major kernel computes h = W @ x^T directly; biases as (out, 1).
    """
    dims = [state_dim] + [hidden_dim] * n_hidden + [1]
    params = []
    for i in range(len(dims) - 1):
        fan_in, fan_out = dims[i], dims[i + 1]
        key, kw, kb = jax.random.split(key, 3)
        bound = 1.0 / math.sqrt(fan_in)
        w = jax.random.uniform(kw, (fan_out, fan_in), jnp.float32, -bound, bound)
        b = jax.random.uniform(kb, (fan_out, 1), jnp.float32, -bound, bound)
        params += [w, b]
    return tuple(params)


def value_function_ref(state, params):
    """Plain-JAX reference (f32) for correctness checking."""
    w1, b1, w2, b2, w3, b3 = params
    h1 = jnp.maximum(state @ w1.T + b1[:, 0], 0.0)
    h2 = jnp.maximum(h1 @ w2.T + b2[:, 0], 0.0)
    return (h2 @ w3.T + b3[:, 0])[:, 0]


if __name__ == "__main__":
    key = jax.random.PRNGKey(0)
    k_params, k1, k2, k3 = jax.random.split(key, 4)

    state_dim, hidden_dim, n_hidden = 16, 32, 2
    params = init_value_function_params(k_params, state_dim, hidden_dim, n_hidden)

    # bf16 MXU operands -> loosened tolerances vs the f32 reference.
    ATOL = RTOL = 2e-2

    # 1) Tiny batch: single full-array block path.
    s = jax.random.normal(k1, (8, state_dim), jnp.float32)
    out = jax.block_until_ready(value_function_forward(s, params))
    ref = value_function_ref(s, params)
    assert out.shape == (8,), out.shape
    assert jnp.allclose(out, ref, atol=ATOL, rtol=RTOL)

    # 2) Mid batch (non-multiple of 128, still < TILE_B): single block.
    s = jax.random.normal(k2, (1030, state_dim), jnp.float32)
    out = jax.block_until_ready(value_function_forward(s, params))
    ref = value_function_ref(s, params)
    assert out.shape == (1030,), out.shape
    assert jnp.allclose(out, ref, atol=ATOL, rtol=RTOL)

    # 3) Multi-tile batch with a ragged edge block: tiled, megacore-parallel
    #    path at the default TILE_B=4096 (no wrapper-side padding).
    B_large = 9000
    s = jax.random.normal(k3, (B_large, state_dim), jnp.float32)
    out = jax.block_until_ready(value_function_forward(s, params))
    ref = value_function_ref(s, params)
    assert out.shape == (B_large,), out.shape
    assert jnp.allclose(out, ref, atol=ATOL, rtol=RTOL)

    print("KERNEL_OK")
</pallas_src>

<mosaic_0001>
module attributes {stable_mosaic.version = 11 : i64} {
  func.func @_value_mlp_kernel(%arg0: i32, %arg1: memref<16x8xf32, #tpu.memory_space<vmem>>, %arg2: memref<32x16xbf16, #tpu.memory_space<vmem>>, %arg3: memref<32x1xf32, #tpu.memory_space<vmem>>, %arg4: memref<32x32xbf16, #tpu.memory_space<vmem>>, %arg5: memref<32x1xf32, #tpu.memory_space<vmem>>, %arg6: memref<32x1xf32, #tpu.memory_space<vmem>>, %arg7: memref<1x1xf32, #tpu.memory_space<vmem>>, %arg8: memref<1x8xf32, #tpu.memory_space<vmem>>) attributes {dimension_semantics = [#tpu.dimension_semantics<parallel>], iteration_bounds = array<i64: 1>, scalar_prefetch = 0 : i64, scratch_operands = 0 : i64, tpu.core_type = #tpu.core_type<tc>, window_params = [{transform_indices = @transform_0, window_bounds = array<i64: 16, 8>}, {pipeline_mode = #tpu.pipeline_mode<synchronous>, transform_indices = @transform_1, window_bounds = array<i64: 32, 16>}, {pipeline_mode = #tpu.pipeline_mode<synchronous>, transform_indices = @transform_2, window_bounds = array<i64: 32, 1>}, {pipeline_mode = #tpu.pipeline_mode<synchronous>, transform_indices = @transform_3, window_bounds = array<i64: 32, 32>}, {pipeline_mode = #tpu.pipeline_mode<synchronous>, transform_indices = @transform_4, window_bounds = array<i64: 32, 1>}, {pipeline_mode = #tpu.pipeline_mode<synchronous>, transform_indices = @transform_5, window_bounds = array<i64: 32, 1>}, {pipeline_mode = #tpu.pipeline_mode<synchronous>, transform_indices = @transform_6, window_bounds = array<i64: 1, 1>}, {transform_indices = @transform_7, window_bounds = array<i64: 1, 8>}]} {
    %c0 = arith.constant 0 : index
    %c0_0 = arith.constant 0 : index
    %0 = vector.load %arg1[%c0, %c0_0] : memref<16x8xf32, #tpu.memory_space<vmem>>, vector<16x8xf32>
    %1 = arith.truncf %0 : vector<16x8xf32> to vector<16x8xbf16>
    %c0_1 = arith.constant 0 : index
    %c0_2 = arith.constant 0 : index
    %2 = vector.load %arg2[%c0_1, %c0_2] : memref<32x16xbf16, #tpu.memory_space<vmem>>, vector<32x16xbf16>
    %cst = arith.constant dense<0.000000e+00> : vector<32x8xf32>
    %3 = tpu.matmul %2, %1, %cst {dimension_numbers = #tpu.dot_dimension_numbers<[1], [0], [0], [1], [0, 0, 1, 1], [], []>} : vector<32x16xbf16>, vector<16x8xbf16>, vector<32x8xf32> -> vector<32x8xf32>
    %c0_3 = arith.constant 0 : index
    %c0_4 = arith.constant 0 : index
    %4 = vector.load %arg3[%c0_3, %c0_4] : memref<32x1xf32, #tpu.memory_space<vmem>>, vector<32x1xf32>
    %5 = vector.broadcast %4 : vector<32x1xf32> to vector<32x8xf32>
    %6 = arith.addf %3, %5 : vector<32x8xf32>
    %cst_5 = arith.constant 0.000000e+00 : f32
    %7 = vector.broadcast %cst_5 : f32 to vector<32x8xf32>
    %8 = arith.maximumf %6, %7 : vector<32x8xf32>
    %c0_6 = arith.constant 0 : index
    %c0_7 = arith.constant 0 : index
    %9 = vector.load %arg4[%c0_6, %c0_7] : memref<32x32xbf16, #tpu.memory_space<vmem>>, vector<32x32xbf16>
    %10 = arith.truncf %8 : vector<32x8xf32> to vector<32x8xbf16>
    %cst_8 = arith.constant dense<0.000000e+00> : vector<32x8xf32>
    %11 = tpu.matmul %9, %10, %cst_8 {dimension_numbers = #tpu.dot_dimension_numbers<[1], [0], [0], [1], [0, 0, 1, 1], [], []>} : vector<32x32xbf16>, vector<32x8xbf16>, vector<32x8xf32> -> vector<32x8xf32>
    %c0_9 = arith.constant 0 : index
    %c0_10 = arith.constant 0 : index
    %12 = vector.load %arg5[%c0_9, %c0_10] : memref<32x1xf32, #tpu.memory_space<vmem>>, vector<32x1xf32>
    %13 = vector.broadcast %12 : vector<32x1xf32> to vector<32x8xf32>
    %14 = arith.addf %11, %13 : vector<32x8xf32>
    %cst_11 = arith.constant 0.000000e+00 : f32
    %15 = vector.broadcast %cst_11 : f32 to vector<32x8xf32>
    %16 = arith.maximumf %14, %15 : vector<32x8xf32>
    %c0_12 = arith.constant 0 : index
    %c0_13 = arith.constant 0 : index
    %17 = vector.load %arg6[%c0_12, %c0_13] : memref<32x1xf32, #tpu.memory_space<vmem>>, vector<32x1xf32>
    %18 = vector.broadcast %17 : vector<32x1xf32> to vector<32x8xf32>
    %19 = arith.mulf %16, %18 : vector<32x8xf32>
    %cst_14 = arith.constant dense<0.000000e+00> : vector<8xf32>
    %20 = vector.multi_reduction <add>, %19, %cst_14 [0] : vector<32x8xf32> to vector<8xf32>
    %21 = vector.shape_cast %20 : vector<8xf32> to vector<1x8xf32>
    %c0_15 = arith.constant 0 : index
    %c0_16 = arith.constant 0 : index
    %22 = vector.load %arg7[%c0_15, %c0_16] : memref<1x1xf32, #tpu.memory_space<vmem>>, vector<1x1xf32>
    %23 = vector.broadcast %22 : vector<1x1xf32> to vector<1x8xf32>
    %24 = arith.addf %21, %23 : vector<1x8xf32>
    %c0_17 = arith.constant 0 : index
    %c0_18 = arith.constant 0 : index
    %25 = vector.load %arg8[%c0_17, %c0_18] : memref<1x8xf32, #tpu.memory_space<vmem>>, vector<1x8xf32>
    tpu.vector_store %arg8[%c0_17, %c0_18], %24 {strides = array<i32>} : memref<1x8xf32, #tpu.memory_space<vmem>>, vector<1x8xf32>,
    return
  }
  func.func @transform_0(%arg0: i32) -> (i32, i32) {
    %c0_i32 = arith.constant 0 : i32
    %c0_i32_0 = arith.constant 0 : i32
    return %c0_i32, %arg0 : i32, i32
  }
  func.func @transform_1(%arg0: i32) -> (i32, i32) {
    %c0_i32 = arith.constant 0 : i32
    %c0_i32_0 = arith.constant 0 : i32
    %c0_i32_1 = arith.constant 0 : i32
    return %c0_i32, %c0_i32_0 : i32, i32
  }
  func.func @transform_2(%arg0: i32) -> (i32, i32) {
    %c0_i32 = arith.constant 0 : i32
    %c0_i32_0 = arith.constant 0 : i32
    %c0_i32_1 = arith.constant 0 : i32
    return %c0_i32, %c0_i32_0 : i32, i32
  }
  func.func @transform_3(%arg0: i32) -> (i32, i32) {
    %c0_i32 = arith.constant 0 : i32
    %c0_i32_0 = arith.constant 0 : i32
    %c0_i32_1 = arith.constant 0 : i32
    return %c0_i32, %c0_i32_0 : i32, i32
  }
  func.func @transform_4(%arg0: i32) -> (i32, i32) {
    %c0_i32 = arith.constant 0 : i32
    %c0_i32_0 = arith.constant 0 : i32
    %c0_i32_1 = arith.constant 0 : i32
    return %c0_i32, %c0_i32_0 : i32, i32
  }
  func.func @transform_5(%arg0: i32) -> (i32, i32) {
    %c0_i32 = arith.constant 0 : i32
    %c0_i32_0 = arith.constant 0 : i32
    %c0_i32_1 = arith.constant 0 : i32
    return %c0_i32, %c0_i32_0 : i32, i32
  }
  func.func @transform_6(%arg0: i32) -> (i32, i32) {
    %c0_i32 = arith.constant 0 : i32
    %c0_i32_0 = arith.constant 0 : i32
    %c0_i32_1 = arith.constant 0 : i32
    return %c0_i32, %c0_i32_0 : i32, i32
  }
  func.func @transform_7(%arg0: i32) -> (i32, i32) {
    %c0_i32 = arith.constant 0 : i32
    %c0_i32_0 = arith.constant 0 : i32
    return %c0_i32, %arg0 : i32, i32
  }
}

</mosaic_0001>

<bundles_post_ra>
// kernel: tpu_custom_call.1
= control target key start
LH: loop header
LB: loop body
LE: loop exit
PB: predicated region body
PF: predicated region fallthrough
CT: control target
= control target key end

     0   :  { %s399_s0 = inlined_call_operand.vmem [shape: f32[16,8], index: 0, kind: input, shape index: {}]   ;;  %s400_s1 = inlined_call_operand.vmem [shape: bf16[32,16], index: 1, kind: input, shape index: {}]   ;;  %s401_s2 = inlined_call_operand.vmem [shape: f32[32,1], index: 2, kind: input, shape index: {}]   ;;  %s402_s3 = inlined_call_operand.vmem [shape: bf16[32,32], index: 3, kind: input, shape index: {}]   ;;  %s403_s4 = inlined_call_operand.vmem [shape: f32[32,1], index: 4, kind: input, shape index: {}]   ;;  %s404_s5 = inlined_call_operand.vmem [shape: f32[32,1], index: 5, kind: input, shape index: {}]   ;;  %s405_s6 = inlined_call_operand.<no memory space> [shape: f32[1,1], index: 6, kind: input, shape index: {}]   ;;  %s406_s7 = inlined_call_operand.hbm [shape: f32[1,8], index: 7, kind: output, shape index: {}]  }
   0x1   :  { %v12_v0 = vstv %s405_s6 }
   0x2   :  { %13 = vst [vmem:[#allocation2] sm:$0x1] %v12_v0 }
   0x3   :  { %v39_v1 = vld [vmem:[%s401_s2 + $0x10] sm:$0xff]  ;;  %v37_v2 = vld [vmem:[%s401_s2] sm:$0xff]  ;;  %v297_v4 = vmov 0   ;;  %v31_v5 = vld [vmem:[%s399_s0 + $0x8] sm:$0xff]  ;;  %vm71_vm0 = vcmask 130048  }
   0x4   :  { %v30_v3 = vld [vmem:[%s399_s0] sm:$0xff]  ;;  %268 = vset.pattern.permute.xlu0 %v297_v4  ;;  %269 = vset.pattern.permute.xlu1 %v297_v4  ;;  %v260_v7 = vld [vmem:[%s400_s1 + $0x8] sm:$0xff] }
   0x5   :  { %53 = vperm.xlu0 %268, %v39_v1   ;;  %43 = vperm.xlu1 %269, %v37_v2   ;;  %v32_v6 = vpack.c.bf16 %v31_v5, %v30_v3  ;;  %v259_v8 = vld [vmem:[%s400_s1] sm:$0xff] }
   0x6   :  { %270 = vset.pattern.permute.xlu2 %v297_v4 }
   0x7   :  { %263 = vmatpush.bf16.msra.mxu3 %v32_v6  ;;  %85 = vmatpush.bf16.msra.mxu0 %v32_v6 }
   0x8   :  { %14 = vsyncpa [#allocation4], 0  ;;  %v40_v9 = vld [vmem:[%s401_s2 + $0x18] sm:$0xff]  ;;  %v38_v10 = vld [vmem:[%s401_s2 + $0x8] sm:$0xff]  ;;  %vm141_vm1 = vcmask 261120   ;;  %vm199_vm2 = vcmask 64512  }
   0x9   :  { %v109_v11 = vld [vmem:[%s403_s4 + $0x10] sm:$0xff]  ;;  %v110_v12 = vld [vmem:[%s403_s4 + $0x18] sm:$0xff]  ;;  %v172_v13 = vld [vmem:[%s404_s5 + $0x8] sm:$0xff]  ;;  %s230_s12 = sshll.u32 %s406_s7, 4  ;;  %vm221_vm3 = vcmask 57344   ;;  %s231_s12 = int_to_ptr.hbm [resolvable:$true] %s230_s12 }
   0xa   :  { %248 = vmatmul.msk.bf16.vlgmr.msra.gmra.mxu3 %vm71_vm0, %v260_v7  ;;  %247 = vmatmul.msk.bf16.vlgmr.msra.gmra.mxu0 %vm71_vm0, %v259_v8  ;;  %v173_v14 = vld [vmem:[%s404_s5 + $0x10] sm:$0xff]  ;;  %v213_v15 = vld [vmem:[#allocation2] sm:$0x1]  ;;  %v108_v18 = vld [vmem:[%s403_s4 + $0x8] sm:$0xff] }
   0xb   :  { %v107_v16 = vld [vmem:[%s403_s4] sm:$0xff]  ;;  %v174_v36 = vld [vmem:[%s404_s5 + $0x18] sm:$0xff]  ;;  %v262_v39 = vld [vmem:[%s402_s3 + $0x8] sm:$0xff] }
   0xc   :  { %113 = vperm.xlu2 %270, %v107_v16   ;;  %v171_v22 = vld [vmem:[%s404_s5] sm:$0xff] }
   0xd   :  { %58 = vperm.xlu0 %268, %v40_v9   ;;  %48 = vperm.xlu1 %269, %v38_v10   ;;  %v261_v38 = vld [vmem:[%s402_s3] sm:$0xff]  ;;  %s298_s3 = smov [#allocation3]  }
   0xe   :  { %s228_s5 = sshll.u32 %s298_s3, 4  ;;  %s229_s5 = int_to_ptr.vmem [resolvable:$true] %s228_s5 }
  0x14   :  { %118 = vperm.xlu2 %270, %v108_v18  }
  0x15   :  { %123 = vperm.xlu0 %268, %v109_v11   ;;  %128 = vperm.xlu1 %269, %v110_v12  }
  0x1c   :  { %177 = vperm.xlu2 %270, %v171_v22  }
  0x1d   :  { %182 = vperm.xlu0 %268, %v172_v13   ;;  %187 = vperm.xlu1 %269, %v173_v14  }
  0x24   :  { %192 = vperm.xlu2 %270, %v174_v36  }
  0x25   :  { %216 = vperm.xlu0 %268, %v213_v15  }
  0x66   :  { %v114_v40 = vpop.permute.xlu2 %113 }
  0x6e   :  { %v119_v41 = vpop.permute.xlu2 %118 }
  0x76   :  { %v178_v49 = vpop.permute.xlu2 %177 }
  0x77   :  { %v54_v19 = vpop.permute.xlu0 %53  ;;  %v44_v20 = vpop.permute.xlu1 %43 }
  0x7e   :  { %v193_v1 = vpop.permute.xlu2 %192 }
  0x7f   :  { %v59_v24 = vpop.permute.xlu0 %58  ;;  %v49_v26 = vpop.permute.xlu1 %48 }
  0x87   :  { %v87_v17 = vpop.f32.mrf.mxu0  ;;  %v124_v43 = vpop.permute.xlu0 %123 }
  0x88   :  { %v88_v28 = vadd.f32 %v87_v17, %v44_v20  ;;  %v129_v45 = vpop.permute.xlu1 %128 }
  0x8a   :  { %v97_v33 = vmax.f32 %v88_v28, 0.0 }
  0x8d   :  { %v92_v21 = vpop.f32.mrf.mxu3 }
  0x8e   :  { %v93_v25 = vadd.f32 %v92_v21, %v54_v19 }
  0x8f   :  { %v89_v23 = vpop.f32.mrf.mxu0  ;;  %v183_v55 = vpop.permute.xlu0 %182 }
  0x90   :  { %v90_v29 = vadd.f32 %v89_v23, %v49_v26  ;;  %v99_v31 = vmax.f32 %v93_v25, 0.0  ;;  %v188_v57 = vpop.permute.xlu1 %187 }
  0x92   :  { %v98_v34 = vmax.f32 %v90_v29, 0.0 }
  0x94   :  { %v105_v37 = vpack.c.bf16 %v98_v34, %v97_v33 }
  0x95   :  { %v94_v27 = vpop.f32.mrf.mxu3 }
  0x96   :  { %v95_v30 = vadd.f32 %v94_v27, %v59_v24 }
  0x97   :  { %v217_v11 = vpop.permute.xlu0 %216 }
  0x98   :  { %v100_v32 = vmax.f32 %v95_v30, 0.0  ;;  %v219_v13 = vperm.slane %v217_v11, 0 }
  0x9a   :  { %v106_v35 = vpack.c.bf16 %v100_v32, %v99_v31 }
  0x9c   :  { %154 = vmatpush.bf16.msra.mxu1 %v106_v35  ;;  %264 = vmatpush.bf16.msra.mxu2 %v106_v35 }
  0xa0   :  { %155 = vmatpush.bf16.msra.mxu1 %v105_v37  ;;  %265 = vmatpush.bf16.msra.mxu2 %v105_v37 }
  0xa3   :  { %257 = vmatmul.msk.bf16.vlgmr.msra.gmra.mxu1 %vm141_vm1, %v261_v38  ;;  %258 = vmatmul.msk.bf16.vlgmr.msra.gmra.mxu2 %vm141_vm1, %v262_v39 }
 0x120   :  { %v157_v42 = vpop.f32.mrf.mxu1 }
 0x121   :  { %v158_v44 = vadd.f32 %v157_v42, %v114_v40 }
 0x123   :  { %v167_v47 = vmax.f32 %v158_v44, 0.0 }
 0x125   :  { %v195_v52 = vmul.f32 %v178_v49, %v167_v47 }
 0x126   :  { %v162_v46 = vpop.f32.mrf.mxu2 }
 0x127   :  { %v163_v48 = vadd.f32 %v162_v46, %v124_v43  ;;  %v200_v59 = vsel %vm199_vm2, %v195_v52, 0.0 }
 0x128   :  { %v159_v50 = vpop.f32.mrf.mxu1 }
 0x129   :  { %v160_v51 = vadd.f32 %v159_v50, %v119_v41  ;;  %v169_v53 = vmax.f32 %v163_v48, 0.0 }
 0x12b   :  { %v168_v54 = vmax.f32 %v160_v51, 0.0  ;;  %v197_v60 = vmul.f32 %v188_v57, %v169_v53 }
 0x12d   :  { %v196_v56 = vmul.f32 %v183_v55, %v168_v54  ;;  %v203_v2 = vsel %vm199_vm2, %v197_v60, 0.0 }
 0x12e   :  { %v164_v58 = vpop.f32.mrf.mxu2 }
 0x12f   :  { %v201_v61 = vsel %vm199_vm2, %v196_v56, 0.0  ;;  %v165_v62 = vadd.f32 %v164_v58, %v129_v45 }
 0x130   :  { %v202_v63 = vadd.f32 %v201_v61, %v200_v59 }
 0x131   :  { %v170_v0 = vmax.f32 %v165_v62, 0.0 }
 0x132   :  { %v204_v4 = vadd.f32 %v203_v2, %v202_v63 }
 0x133   :  { %v198_v3 = vmul.f32 %v193_v1, %v170_v0 }
 0x135   :  { %v205_v5 = vsel %vm199_vm2, %v198_v3, 0.0 }
 0x136   :  { %v206_v6 = vadd.f32 %v205_v5, %v204_v4 }
 0x138   :  { %v207_v7 = vrot.slane %v206_v6, 4 }
 0x13a   :  { %v208_v8 = vadd.f32 %v207_v7, %v206_v6 }
 0x13c   :  { %v209_v9 = vrot.slane %v208_v8, 2 }
 0x13e   :  { %v210_v10 = vadd.f32 %v209_v9, %v208_v8 }
 0x140   :  { %v211_v12 = vrot.slane %v210_v10, 1 }
 0x142   :  { %v212_v14 = vadd.f32 %v211_v12, %v210_v10 }
 0x144   :  { %v220_v15 = vadd.f32 %v219_v13, %v212_v14 }
 0x146   :  { %222 = vst.msk [vmem:[#allocation3] sm:$0x1] %vm221_vm3, %v220_v15 }
 0x147   :  { %233 = dma.vmem_to_hbm [thread:$0]  %s229_s5, 16, %s231_s12, [#allocation4]  }
 0x148   :  { %295 = dma.done.wait [#allocation4], 16  }
 0x149   :  { %296 = vsyncadd [#allocation4], 4294967280 }
 0x14a   :  { %238 = vsyncpa [#allocation4], 1 }

</bundles_post_ra>
